<compile_context>
chip_gen: v7x
topology: tpu7x:2x2x1
jax: 0.10.0
libtpu: 0.0.40
codegen_flags: <defaults>
</compile_context>

<pallas_src>
import functools
import math

import jax
import jax.numpy as jnp
from jax.experimental import pallas as pl
from jax.experimental.pallas import tpu as pltpu


def _mha_head_kernel(x_ref, w_ref, b_ref, o_ref, *, block_q, block_kv):
    # x_ref: (bb, S, E)       one batch group (full sequence, full embed)
    # w_ref: (1, E, 3D)       this head's fused [Wq*scale | Wk | Wv]  (bf16)
    # b_ref: (1, 1, 3D)       this head's fused [bq*scale | bk | bv]  (f32)
    # o_ref: (1, bb, bq, D)   this head's context for the current q tile
    bb, S, E = x_ref.shape
    D = w_ref.shape[-1] // 3
    bq, bkv = block_q, block_kv

    w = w_ref[0]                                     # (E, 3D) bf16
    b = b_ref[0]                                     # (1, 3D) f32

    # ---- Projections: bf16 MXU operands, f32 accumulate -------------------
    # (bb, S, E) -> (bb*S, E): leading/sublane regroup only, lane dim intact.
    x_kv = x_ref[...].reshape(bb * S, E).astype(jnp.bfloat16)
    if bq == S:
        # q tile covers the whole sequence: single fused (E, 3D) matmul.
        qkv = jnp.dot(x_kv, w, preferred_element_type=jnp.float32) + b
        q_cols = qkv[:, :D]
        k_cols = qkv[:, D:2 * D]
        v_cols = qkv[:, 2 * D:]
    else:
        # General path: Q only for this q tile, K/V for the full sequence.
        q_start = pl.multiple_of(pl.program_id(1) * bq, bq)
        x_q = x_ref[:, pl.ds(q_start, bq), :].reshape(bb * bq, E)
        x_q = x_q.astype(jnp.bfloat16)
        q_cols = jnp.dot(x_q, w[:, :D], preferred_element_type=jnp.float32) + b[:, :D]
        kv = jnp.dot(x_kv, w[:, D:], preferred_element_type=jnp.float32) + b[:, D:]
        k_cols = kv[:, :D]
        v_cols = kv[:, D:]

    q = q_cols.reshape(bb, bq, D).astype(jnp.bfloat16)
    k = k_cols.reshape(bb, S, D).astype(jnp.bfloat16)
    v = v_cols.reshape(bb, S, D).astype(jnp.bfloat16)

    # ---- Online softmax over KV chunks (flash): score VMEM <= bb*bq*bkv ----
    m = jnp.full((bb, bq, 1), -jnp.inf, jnp.float32)
    l = jnp.zeros((bb, bq, 1), jnp.float32)
    acc = jnp.zeros((bb, bq, D), jnp.float32)
    for j in range(S // bkv):            # static unroll; 1 chunk at demo shapes
        k_j = k[:, j * bkv:(j + 1) * bkv, :]
        v_j = v[:, j * bkv:(j + 1) * bkv, :]
        s = jnp.einsum("bqd,bkd->bqk", q, k_j,
                       preferred_element_type=jnp.float32)   # (bb, bq, bkv) f32
        m_new = jnp.maximum(m, s.max(axis=-1, keepdims=True))
        alpha = jnp.exp(m - m_new)
        p = jnp.exp(s - m_new)
        l = alpha * l + p.sum(axis=-1, keepdims=True)
        acc = alpha * acc + jnp.einsum("bqk,bkd->bqd",
                                       p.astype(jnp.bfloat16), v_j,
                                       preferred_element_type=jnp.float32)
        m = m_new

    out = acc * pl.reciprocal(l, approx=True)                 # (bb, bq, D) f32
    o_ref[0] = out.astype(o_ref.dtype)


def multi_head_attention(x, wq, bq, wk, bk, wv, bv, *, num_head,
                         block_q=None, block_kv=None, batch_block=None):
    B, S, E = x.shape
    H = num_head
    D = E // H

    # ---- One-time parameter prep (amortized across calls for fixed weights):
    # fold the 1/sqrt(D) attention scale into Wq/bq and regroup the fused
    # [Wq|Wk|Wv] columns per head -> (H, E, 3D), weights in bf16.
    scale = 1.0 / math.sqrt(D)

    def heads(w):                                   # (E, E) -> (H, E, D)
        return jnp.transpose(w.reshape(E, H, D), (1, 0, 2))

    def heads_b(b):                                 # (E,) -> (H, 1, D)
        return b.reshape(H, 1, D)

    w_heads = jnp.concatenate([heads(wq * scale), heads(wk), heads(wv)],
                              axis=-1).astype(jnp.bfloat16)           # (H, E, 3D)
    b_heads = jnp.concatenate([heads_b(bq * scale), heads_b(bk), heads_b(bv)],
                              axis=-1).astype(jnp.float32)            # (H, 1, 3D)

    # ---- Tile sizes: toy shapes collapse to a single tile per axis --------
    if block_q is None:
        block_q = S if S <= 256 else 256            # <=256 q rows per step
    if block_kv is None:
        block_kv = S if S <= 512 else 512           # KV chunk for online softmax
    if batch_block is None:
        # Fold tiny batches into one grid step (per-step overhead ~0.35us).
        batch_block = B if B * S * E * x.dtype.itemsize <= (2 << 20) else 1
    assert S % block_q == 0 and S % block_kv == 0 and B % batch_block == 0, (
        "TODO(synk): ragged tiles not handled")

    grid = (B // batch_block, S // block_q, H)

    kernel = functools.partial(_mha_head_kernel,
                               block_q=block_q, block_kv=block_kv)

    out = pl.pallas_call(
        kernel,
        out_shape=jax.ShapeDtypeStruct((H, B, S, D), x.dtype),
        grid_spec=pltpu.PrefetchScalarGridSpec(
            num_scalar_prefetch=0,
            grid=grid,
            in_specs=[
                # x: one batch group, full sequence (same block across qi/h
                # -> no re-DMA within a batch group).
                pl.BlockSpec((batch_block, S, E), lambda g, qi, h: (g, 0, 0)),
                # per-head fused weight / bias selected by the grid index.
                pl.BlockSpec((1, E, 3 * D), lambda g, qi, h: (h, 0, 0)),
                pl.BlockSpec((1, 1, 3 * D), lambda g, qi, h: (h, 0, 0)),
            ],
            out_specs=pl.BlockSpec((1, batch_block, block_q, D),
                                   lambda g, qi, h: (h, g, qi, 0)),
        ),
        compiler_params=pltpu.CompilerParams(
            dimension_semantics=("parallel", "parallel", "parallel"),
            vmem_limit_bytes=48 * 1024 * 1024),
    )(x, w_heads, b_heads)

    # (H, B, S, D) -> (B, S, H*D): wrapper-side layout plumbing.  With real
    # head_dim (>=128) the per-head kernel store is already lane-dense and
    # this is a cheap retile; at the toy D=8 everything is tiny anyway.
    return jnp.transpose(out, (1, 2, 0, 3)).reshape(B, S, E)


def _reference(x, wq, bq, wk, bk, wv, bv, num_head):
    # Plain-JAX (all-f32) mirror of the PyTorch forward.
    B, S, E = x.shape
    D = E // num_head
    q = (x @ wq + bq).reshape(B, S, num_head, D).transpose(0, 2, 1, 3)
    k = (x @ wk + bk).reshape(B, S, num_head, D).transpose(0, 2, 1, 3)
    v = (x @ wv + bv).reshape(B, S, num_head, D).transpose(0, 2, 1, 3)
    attn = jnp.einsum("bhqd,bhkd->bhqk", q, k) / jnp.sqrt(jnp.float32(D))
    score = jax.nn.softmax(attn, axis=-1)
    out = jnp.einsum("bhqk,bhkd->bhqd", score, v)
    return out.transpose(0, 2, 1, 3).reshape(B, S, E)


if __name__ == "__main__":
    # Small shapes consistent with the module: embed_dim=32, num_head=4.
    B, S, E, H = 2, 8, 32, 4

    key = jax.random.PRNGKey(0)
    kx, kwq, kbq, kwk, kbk, kwv, kbv = jax.random.split(key, 7)

    x = jax.random.normal(kx, (B, S, E), dtype=jnp.float32)
    lim = 1.0 / math.sqrt(E)
    wq = jax.random.uniform(kwq, (E, E), jnp.float32, -lim, lim)
    bq = jax.random.uniform(kbq, (E,), jnp.float32, -lim, lim)
    wk = jax.random.uniform(kwk, (E, E), jnp.float32, -lim, lim)
    bk = jax.random.uniform(kbk, (E,), jnp.float32, -lim, lim)
    wv = jax.random.uniform(kwv, (E, E), jnp.float32, -lim, lim)
    bv = jax.random.uniform(kbv, (E,), jnp.float32, -lim, lim)

    out = multi_head_attention(x, wq, bq, wk, bk, wv, bv, num_head=H)
    out = jax.block_until_ready(out)

    ref = _reference(x, wq, bq, wk, bk, wv, bv, H)
    assert out.shape == (B, S, E)
    # Tolerance reflects bf16 MXU operands (per perf review) plus the
    # approximate (EUP) softmax reciprocal, compared against an all-f32
    # reference: expected error ~1e-2 absolute on O(1) outputs.
    assert jnp.allclose(out, ref, atol=5e-2, rtol=5e-2), (
        "mismatch vs reference; max abs diff = "
        f"{float(jnp.max(jnp.abs(out - ref)))}")

    print("KERNEL_OK")
</pallas_src>

<mosaic_0001>
module attributes {stable_mosaic.version = 11 : i64} {
  func.func @_mha_head_kernel(%arg0: i32, %arg1: i32, %arg2: i32, %arg3: memref<2x8x32xf32, #tpu.memory_space<vmem>>, %arg4: memref<1x32x24xbf16, #tpu.memory_space<vmem>>, %arg5: memref<1x1x24xf32, #tpu.memory_space<vmem>>, %arg6: memref<1x2x8x8xf32, #tpu.memory_space<vmem>>) attributes {dimension_semantics = [#tpu.dimension_semantics<parallel>, #tpu.dimension_semantics<parallel>, #tpu.dimension_semantics<parallel>], iteration_bounds = array<i64: 1, 1, 4>, scalar_prefetch = 0 : i64, scratch_operands = 0 : i64, tpu.core_type = #tpu.core_type<tc>, window_params = [{transform_indices = @transform_0, window_bounds = array<i64: 2, 8, 32>}, {transform_indices = @transform_1, window_bounds = array<i64: 1, 32, 24>}, {transform_indices = @transform_2, window_bounds = array<i64: 1, 1, 24>}, {transform_indices = @transform_3, window_bounds = array<i64: 1, 2, 8, 8>}]} {
    %c0 = arith.constant 0 : index
    %c0_0 = arith.constant 0 : index
    %c0_1 = arith.constant 0 : index
    %0 = vector.load %arg4[%c0, %c0_0, %c0_1] : memref<1x32x24xbf16, #tpu.memory_space<vmem>>, vector<1x32x24xbf16>
    %1 = vector.shape_cast %0 : vector<1x32x24xbf16> to vector<32x24xbf16>
    %c0_2 = arith.constant 0 : index
    %c0_3 = arith.constant 0 : index
    %c0_4 = arith.constant 0 : index
    %2 = vector.load %arg5[%c0_2, %c0_3, %c0_4] : memref<1x1x24xf32, #tpu.memory_space<vmem>>, vector<1x1x24xf32>
    %3 = vector.shape_cast %2 : vector<1x1x24xf32> to vector<1x24xf32>
    %c0_5 = arith.constant 0 : index
    %c0_6 = arith.constant 0 : index
    %c0_7 = arith.constant 0 : index
    %4 = vector.load %arg3[%c0_5, %c0_6, %c0_7] : memref<2x8x32xf32, #tpu.memory_space<vmem>>, vector<2x8x32xf32>
    %5 = vector.shape_cast %4 : vector<2x8x32xf32> to vector<16x32xf32>
    %6 = arith.truncf %5 : vector<16x32xf32> to vector<16x32xbf16>
    %cst = arith.constant dense<0.000000e+00> : vector<16x24xf32>
    %7 = tpu.matmul %6, %1, %cst {dimension_numbers = #tpu.dot_dimension_numbers<[1], [0], [0], [1], [0, 0, 1, 1], [], []>} : vector<16x32xbf16>, vector<32x24xbf16>, vector<16x24xf32> -> vector<16x24xf32>
    %8 = vector.broadcast %3 : vector<1x24xf32> to vector<16x24xf32>
    %9 = arith.addf %7, %8 : vector<16x24xf32>
    %10 = vector.extract_strided_slice %9 {offsets = [0, 0], sizes = [16, 8], strides = [1, 1]} : vector<16x24xf32> to vector<16x8xf32>
    %11 = vector.extract_strided_slice %9 {offsets = [0, 8], sizes = [16, 8], strides = [1, 1]} : vector<16x24xf32> to vector<16x8xf32>
    %12 = vector.extract_strided_slice %9 {offsets = [0, 16], sizes = [16, 8], strides = [1, 1]} : vector<16x24xf32> to vector<16x8xf32>
    %13 = vector.shape_cast %10 : vector<16x8xf32> to vector<2x8x8xf32>
    %14 = arith.truncf %13 : vector<2x8x8xf32> to vector<2x8x8xbf16>
    %15 = vector.shape_cast %11 : vector<16x8xf32> to vector<2x8x8xf32>
    %16 = arith.truncf %15 : vector<2x8x8xf32> to vector<2x8x8xbf16>
    %17 = vector.shape_cast %12 : vector<16x8xf32> to vector<2x8x8xf32>
    %18 = arith.truncf %17 : vector<2x8x8xf32> to vector<2x8x8xbf16>
    %cst_8 = arith.constant 0xFF800000 : f32
    %19 = vector.broadcast %cst_8 : f32 to vector<2x8x1xf32>
    %cst_9 = arith.constant 0.000000e+00 : f32
    %20 = vector.broadcast %cst_9 : f32 to vector<2x8x1xf32>
    %cst_10 = arith.constant 0.000000e+00 : f32
    %21 = vector.broadcast %cst_10 : f32 to vector<2x8x8xf32>
    "tpu.trace_start"() <{level = 10 : i32, message = "bqd,bkd->bqk"}> : () -> ()
    %cst_11 = arith.constant dense<0.000000e+00> : vector<2x8x8xf32>
    %22 = tpu.matmul %14, %16, %cst_11 {dimension_numbers = #tpu.dot_dimension_numbers<[2], [2], [1], [1], [0, 0, 0, 1, 1, 1], [0], [0]>} : vector<2x8x8xbf16>, vector<2x8x8xbf16>, vector<2x8x8xf32> -> vector<2x8x8xf32>
    "tpu.trace_stop"() : () -> ()
    %cst_12 = arith.constant dense<0xFF800000> : vector<2x8xf32>
    %23 = vector.multi_reduction <maximumf>, %22, %cst_12 [2] : vector<2x8x8xf32> to vector<2x8xf32>
    %24 = vector.shape_cast %23 : vector<2x8xf32> to vector<2x8x1xf32>
    %25 = arith.maximumf %19, %24 : vector<2x8x1xf32>
    %26 = arith.subf %19, %25 : vector<2x8x1xf32>
    %27 = math.exp %26 : vector<2x8x1xf32>
    %28 = vector.broadcast %25 : vector<2x8x1xf32> to vector<2x8x8xf32>
    %29 = arith.subf %22, %28 : vector<2x8x8xf32>
    %30 = math.exp %29 : vector<2x8x8xf32>
    %31 = arith.mulf %27, %20 : vector<2x8x1xf32>
    %cst_13 = arith.constant dense<0.000000e+00> : vector<2x8xf32>
    %32 = vector.multi_reduction <add>, %30, %cst_13 [2] : vector<2x8x8xf32> to vector<2x8xf32>
    %33 = vector.shape_cast %32 : vector<2x8xf32> to vector<2x8x1xf32>
    %34 = arith.addf %31, %33 : vector<2x8x1xf32>
    %35 = vector.broadcast %27 : vector<2x8x1xf32> to vector<2x8x8xf32>
    %36 = arith.mulf %35, %21 : vector<2x8x8xf32>
    %37 = arith.truncf %30 : vector<2x8x8xf32> to vector<2x8x8xbf16>
    "tpu.trace_start"() <{level = 10 : i32, message = "bqk,bkd->bqd"}> : () -> ()
    %cst_14 = arith.constant dense<0.000000e+00> : vector<2x8x8xf32>
    %38 = tpu.matmul %37, %18, %cst_14 {dimension_numbers = #tpu.dot_dimension_numbers<[2], [1], [1], [2], [0, 0, 0, 1, 1, 2], [0], [0]>} : vector<2x8x8xbf16>, vector<2x8x8xbf16>, vector<2x8x8xf32> -> vector<2x8x8xf32>
    "tpu.trace_stop"() : () -> ()
    %39 = arith.addf %36, %38 : vector<2x8x8xf32>
    %40 = tpu.reciprocal %34 {approx = true} : vector<2x8x1xf32> -> vector<2x8x1xf32>
    %41 = vector.broadcast %40 : vector<2x8x1xf32> to vector<2x8x8xf32>
    %42 = arith.mulf %39, %41 : vector<2x8x8xf32>
    %c0_15 = arith.constant 0 : index
    %c0_16 = arith.constant 0 : index
    %c0_17 = arith.constant 0 : index
    %c0_18 = arith.constant 0 : index
    %43 = vector.load %arg6[%c0_15, %c0_16, %c0_17, %c0_18] : memref<1x2x8x8xf32, #tpu.memory_space<vmem>>, vector<1x2x8x8xf32>
    %44 = vector.shape_cast %43 : vector<1x2x8x8xf32> to vector<2x8x8xf32>
    %45 = vector.shape_cast %42 : vector<2x8x8xf32> to vector<1x2x8x8xf32>
    tpu.vector_store %arg6[%c0_15, %c0_16, %c0_17, %c0_18], %45 {strides = array<i32>} : memref<1x2x8x8xf32, #tpu.memory_space<vmem>>, vector<1x2x8x8xf32>,
    return
  }
  func.func @transform_0(%arg0: i32, %arg1: i32, %arg2: i32) -> (i32, i32, i32) {
    %c0_i32 = arith.constant 0 : i32
    %c0_i32_0 = arith.constant 0 : i32
    %c0_i32_1 = arith.constant 0 : i32
    return %arg0, %c0_i32, %c0_i32_0 : i32, i32, i32
  }
  func.func @transform_1(%arg0: i32, %arg1: i32, %arg2: i32) -> (i32, i32, i32) {
    %c0_i32 = arith.constant 0 : i32
    %c0_i32_0 = arith.constant 0 : i32
    %c0_i32_1 = arith.constant 0 : i32
    return %arg2, %c0_i32, %c0_i32_0 : i32, i32, i32
  }
  func.func @transform_2(%arg0: i32, %arg1: i32, %arg2: i32) -> (i32, i32, i32) {
    %c0_i32 = arith.constant 0 : i32
    %c0_i32_0 = arith.constant 0 : i32
    %c0_i32_1 = arith.constant 0 : i32
    return %arg2, %c0_i32, %c0_i32_0 : i32, i32, i32
  }
  func.func @transform_3(%arg0: i32, %arg1: i32, %arg2: i32) -> (i32, i32, i32, i32) {
    %c0_i32 = arith.constant 0 : i32
    %c0_i32_0 = arith.constant 0 : i32
    return %arg2, %arg0, %arg1, %c0_i32 : i32, i32, i32, i32
  }
}

</mosaic_0001>

<bundles_post_ra>
// kernel: tpu_custom_call.1
= control target key start
LH: loop header
LB: loop body
LE: loop exit
PB: predicated region body
PF: predicated region fallthrough
CT: control target
= control target key end

     0   :  { %8 = vsyncpa [#allocation3], 0  ;;  %s1049_s0 = inlined_call_operand.vmem [shape: f32[2,8,32], index: 0, kind: input, shape index: {}]   ;;  %s1050_s1 = inlined_call_operand.vmem [shape: bf16[4,32,24], index: 1, kind: input, shape index: {}]   ;;  %s1051_s2 = inlined_call_operand.vmem [shape: f32[4,1,24], index: 2, kind: input, shape index: {}]   ;;  %s1052_s3 = inlined_call_operand.hbm [shape: f32[4,2,8,8], index: 3, kind: output, shape index: {}]  }
   0x1   :  { %10 = vsyncpa [#allocation3 + $0x1], 0  ;;  %s904_s12 = smov 0   ;;  %s906_s13 = smov 0  }
   0x2   :  { %s908_s14 = smov 0   ;;  %s910_s15 = smov 0  }
   0x3   :  { %s912_s16 = smov 0   ;;  %s914_s17 = smov 0  }
   0x4 LB: > { %s655_s18 = sadd.s32 4294967295, %s875_s17   ;;  %s656_s19 = sadd.s32 4294967294, %s875_s17   ;;  %s875_s17 = sphi %s914_s17, %s16_s17   ;;  %s871_s16 = sphi %s912_s16, %s1059_s16   ;;  %s867_s15 = sphi %s910_s15, %s1058_s15   ;;  %s863_s14 = sphi %s908_s14, %s1057_s14   ;;  %s859_s13 = sphi %s906_s13, %s1056_s13   ;;  %s855_s12 = sphi %s904_s12, %s1055_s12  }
   0x5   : > { %s28_s20 = sadd.s32 1, %s871_s16  ;;  %s124_s21 = sadd.s32 1, %s863_s14 }
   0x6   : > { %p29_p0 = scmp.ge.s32.totalorder %s28_s20, 4  ;;  %p134_p1 = scmp.ne.s32.totalorder %s863_s14, %s859_s13 }
   0x7   : > { %p135_p2 = scmp.eq.s32.totalorder %s655_s18, 3  ;;  %p140_p3 = scmp.ne.s32.totalorder %s859_s13, %s855_s12 }
   0x8   : > { %s1061_s20 = smov (%p29_p0, %s28_s20), 0  ;;  %p141_p5 = scmp.eq.s32.totalorder %s656_s19, 3 }
   0x9   : > { %p944_p4 = por %p135_p2, %p134_p1  ;;  %s117_s23 = ssub.s32 %s871_s16, %s1061_s20 }
   0xa   : > { %p660_p6 = scmp.ge.s32.totalorder %s875_s17, 1  ;;  %p122_p7 = scmp.eq.s32.totalorder %s117_s23, 0 }
   0xb   : > { %p951_p8 = por %p141_p5, %p140_p3  ;;  %p182_p9 = scmp.lt.s32.totalorder %s875_s17, 5 }
   0xc   : > { %s957_s25 = scalar_select %p122_p7, %s863_s14, %s124_s21  }
   0xd   : > { %p183_p10 = pnand %p660_p6, %p182_p9 }
   0xe   : > { %p220_p11 = scmp.lt.s32.totalorder (!%p183_p10), %s867_s15, 3  ;;  %v877_v0 = vmov (!%p183_p10), 0.0   ;;  %vm878_vm0 = vmmov (!%p183_p10), 0   ;;  %v235_v3 = vld [vmem:[%s1049_s0] sm:$0xff] (!%p183_p10)  ;;  %v236_v4 = vld [vmem:[%s1049_s0 + $0x8] sm:$0xff] (!%p183_p10)  ;;  %vm256_vm1 = vcmask (!%p183_p10), 261120  }
   0xf   : > { %186 = sbr.rel (%p183_p10) target bundleno = 980 (0x3d4), region = 32  ;;  %690 = vmatprep.subr.bf16.mxu0 (!%p183_p10), %v877_v0  ;;  %694 = vmatprep.mubr.msk.bf16.mxu0 (!%p183_p10), %vm878_vm0, %v877_v0  ;;  %v237_v5 = vpack.c.bf16 (!%p183_p10), %v236_v4, %v235_v3  ;;  %s879_s11 = smov (!%p183_p10), 120   ;;  %vm306_vm2 = vcmask (!%p183_p10), 64512   ;;  %vm437_vm3 = vcmask (!%p183_p10), 1043456  }
  0x10   : > { %698 = vmatprep.subr.bf16.mxu1 (!%p183_p10), %v877_v0  ;;  %700 = vmatprep.mubr.msk.bf16.mxu1 (!%p183_p10), %vm878_vm0, %v877_v0  ;;  %s880_s18 = smov (!%p183_p10), 112   ;;  %s211_s19 = sand.u32 (!%p183_p10), 1, %s859_s13  }
  0x11   : > { %s661_s21 = sshll.u32 (!%p183_p10), %s211_s19, 4  ;;  %s881_s5 = smov (!%p183_p10), [#allocation2]  }
  0x12   : > { %s213_s23 = scalar_lea.vmem (!%p183_p10), [#allocation2], %s661_s21  ;;  %s801_s6 = sshll.u32 (!%p183_p10), %s881_s5, 4  ;;  %s802_s6 = int_to_ptr.vmem [resolvable:$false] %s801_s6 }
  0x13   : > { %s803_s7 = scalar_lea.vmem (!%p183_p10), %s802_s6, 512 }
  0x16   : > { %s221_s26 = scalar_select %p220_p11, %s867_s15, 3 }
  0x18   : > { %s677_s27 = sshll.u32 %s221_s26, 4  ;;  %s227_s10 = scalar_lea.vmem %s1051_s2, %s221_s26 }
  0x19   : > { %s224_s30 = scalar_lea.vmem %s1050_s1, %s677_s27  ;;  %v664_v6 = vld [vmem:[%s227_s10] ss:$0 sm:$0xff]  ;;  %s554_s26 = sshll.u32 %s213_s23, 4  ;;  %s1000_s26 = int_to_ptr.vmem [resolvable:$true] %s554_s26 }
  0x1a   : > { %v783_v1 = vld [vmem:[%s224_s30] sm:$0xff]   ;;  %v784_v2 = vld [vmem:[%s224_s30 + $0x8] sm:$0xff]   ;;  %s678_s27 = sshll.u32 %s867_s15, 8  ;;  %s1003_s15 = scalar_lea.sflag [#allocation3], %s211_s19 }
  0x1b   : > { %691 = vmatpush3.bf16.msra.mxu0 %v783_v1  ;;  %s998_s30 = scalar_lea.hbm %s1052_s3, %s678_s27  ;;  %s797_s4 = scalar_lea.vmem %s1000_s26, 256 }
  0x1c   : > { %692 = vmatprep.subr.bf16.mxu0 %v877_v0  ;;  %p798_p12 = scmp.ne.s32.totalorder %s1000_s26, %s797_s4  ;;  %p804_p1 = scmp.lt.s32.totalorder %s1000_s26, %s802_s6 }
  0x1d   : > { %p805_p2 = scmp.lt.s32.totalorder %s803_s7, %s797_s4 }
  0x1e   : > { %p799_p13 = pnand %p798_p12, %p944_p4 }
  0x1f   : > { %693 = vmatpush3.bf16.msra.mxu0 %v784_v2  ;;  %p806_p3 = por %p805_p2, %p804_p1 }
  0x20   : > { %704 = vmatprep.subr.bf16.mxu0 %v877_v0  ;;  %p800_p0 = pneg %p799_p13 }
  0x22   : > { %695 = vmatmul.mubr.msk.bf16.vlgmr.msra.gmra.mrb[0].mxu0 %vm256_vm1, %v237_v5  ;;  %p807_p5 = pnand %p806_p3, %p800_p0 }
  0x23   : > { %706 = vmatprep.mubr.msk.bf16.mxu0 %vm878_vm0, %v877_v0 }
  0xf5   : > { %v294_v7 = vpop.f32.mrb[0].mxu0 }
  0xf6   : > { %v295_v8 = vadd.f32 %v664_v6, %v294_v7  ;;  %v696_v9 = vpop.f32.mrb[1].mxu0 }
  0xf7   : > { %v297_v10 = vpop.f32.mrb[2].mxu0 }
  0xf8   : > { %v301_v11 = vpack.c.bf16 %v295_v8, %v295_v8  ;;  %v298_v12 = vadd.f32 %v664_v6, %v297_v10  ;;  %v697_v13 = vpop.f32.mrb[3].mxu0 }
  0xfa   : > { %304 = vrot.lane.b32.xlu0 %v301_v11, %s879_s11  ;;  %v302_v14 = vpack.c.bf16 %v298_v12, %v298_v12 }
  0xfe   : > { %354 = vrot.lane.b32.xlu0 %v302_v14, %s879_s11 }
 0x102   : > { %432 = vrot.lane.b32.xlu0 %v301_v11, %s880_s18 }
 0x16c   : > { %v305_v15 = vpop.permute.xlu0 %304 }
 0x16d   : > { %v311_v16 = vsel %vm306_vm2, %v305_v15, 0 }
 0x16e   : > { %699 = vmatpush3.bf16.xpose.msra.mxu1 %v311_v16 }
 0x16f   : > { %710 = vmatprep.subr.bf16.mxu1 %v877_v0 }
 0x170   : > { %v355_v17 = vpop.permute.xlu0 %354 }
 0x171   : > { %v360_v18 = vsel %vm306_vm2, %v355_v17, 0 }
 0x172   : > { %705 = vmatpush3.bf16.xpose.msra.mxu0 %v360_v18 }
 0x173   : > { %716 = vmatprep.subr.bf16.mxu0 %v877_v0 }
 0x174   : > { %v433_v19 = vpop.permute.xlu0 %432 }
 0x175   : > { %v439_v20 = vsel %vm437_vm3, %v433_v19, 0  ;;  %701 = vmatmul.mubr.msk.bf16.vlgmr.msra.gmra.mrb[0].mxu1 %vm306_vm2, %v301_v11 }
 0x176   : > { %711 = vmatpush3.bf16.msra.mxu1 %v439_v20  ;;  %712 = vmatprep.mubr.msk.bf16.mxu1 %vm878_vm0, %v877_v0 }
 0x179   : > { %707 = vmatmul.mubr.msk.bf16.vlgmr.msra.gmra.mrb[4].mxu0 %vm306_vm2, %v302_v14 }
 0x17a   : > { %718 = vmatprep.mubr.msk.bf16.mxu0 %vm878_vm0, %v877_v0 }
 0x248   : > { %v347_v21 = vpop.f32.mrb[0].mxu1 }
 0x249   : > { %v702_v22 = vpop.f32.mrb[1].mxu1  ;;  %v402_v23 = vsel %vm306_vm2, %v347_v21, -inf }
 0x24a   : > { %403 = vmax.xlane.f32.xlu1 %v402_v23  ;;  %v350_v24 = vpop.f32.mrb[2].mxu1 }
 0x24b   : > { %v703_v25 = vpop.f32.mrb[3].mxu1 }
 0x24c   : > { %v396_v26 = vpop.f32.mrb[4].mxu0 }
 0x24d   : > { %v708_v27 = vpop.f32.mrb[5].mxu0  ;;  %v405_v28 = vsel %vm306_vm2, %v396_v26, -inf }
 0x24e   : > { %406 = vmax.xlane.f32.xlu1 %v405_v28  ;;  %v399_v29 = vpop.f32.mrb[6].mxu0 }
 0x24f   : > { %v709_v30 = vpop.f32.mrb[7].mxu0 }
 0x25f   : > { %481 = vrot.lane.b32.xlu1 %v302_v14, %s880_s18 }
 0x2d7   : > { %v404_v31 = vpop.xlane.xlu1 %403 }
 0x2d8   : > { %v414_v32 = vsub.f32 %v347_v21, %v404_v31  ;;  %v408_v45 = vsub.f32 -inf, %v404_v31 }
 0x2da   : > { %v416_v33 = vmul.f32 1.442695, %v414_v32  ;;  %v410_v46 = vmul.f32 1.442695, %v408_v45 }
 0x2db   : > { %v407_v34 = vpop.xlane.xlu1 %406 }
 0x2dc   : > { %v415_v35 = vsub.f32 %v396_v26, %v407_v34  ;;  %785 = vpow2.f32 %v416_v33  ;;  %v409_v47 = vsub.f32 -inf, %v407_v34 }
 0x2de   : > { %v418_v36 = vmul.f32 1.442695, %v415_v35  ;;  %v412_v48 = vmul.f32 1.442695, %v409_v47 }
 0x2df   : > { %v482_v37 = vpop.permute.xlu1 %481 }
 0x2e0   : > { %v487_v38 = vsel %vm437_vm3, %v482_v37, 0  ;;  %787 = vpow2.f32 %v418_v36 }
 0x2e1   : > { %717 = vmatpush3.bf16.msra.mxu0 %v487_v38  ;;  %789 = vpow2.f32 %v410_v46 }
 0x2e2   : > { %791 = vpow2.f32 %v412_v48 }
 0x2e6   : > { %v786_v39 = vpop.eup %785 }
 0x2e7   : > { %v422_v40 = vsel %vm306_vm2, %v786_v39, 0.0  ;;  %v430_v41 = vpack.c.bf16 %v786_v39, %v786_v39 }
 0x2e8   : > { %423 = vadd.xlane.f32.xlu0 %v422_v40 }
 0x2e9   : > { %713 = vmatmul.mubr.msk.bf16.vlgmr.msra.gmra.mrb[4].mxu1 %vm306_vm2, %v430_v41 }
 0x2ea   : > { %v788_v42 = vpop.eup %787 }
 0x2eb   : > { %v425_v43 = vsel %vm306_vm2, %v788_v42, 0.0  ;;  %v431_v44 = vpack.c.bf16 %v788_v42, %v788_v42  ;;  %v790_v49 = vpop.eup %789 }
 0x2ec   : > { %426 = vadd.xlane.f32.xlu1 %v425_v43  ;;  %v420_v51 = vmul.f32 0.0, %v790_v49  ;;  %v792_v52 = vpop.eup %791 }
 0x2ed   : > { %719 = vmatmul.mubr.msk.bf16.vlgmr.msra.gmra.mrb[8].mxu0 %vm306_vm2, %v431_v44  ;;  %v421_v55 = vmul.f32 0.0, %v792_v52 }
 0x375   : > { %v424_v50 = vpop.xlane.xlu0 %423 }
 0x376   : > { %v428_v53 = vadd.f32 %v424_v50, %v420_v51 }
 0x378   : > { %793 = vrcp.f32 %v428_v53 }
 0x379   : > { %v427_v54 = vpop.xlane.xlu1 %426 }
 0x37a   : > { %v429_v56 = vadd.f32 %v427_v54, %v421_v55 }
 0x37c   : > { %795 = vrcp.f32 %v429_v56 }
 0x382   : > { %v794_v60 = vpop.eup %793 }
 0x386   : > { %v796_v3 = vpop.eup %795 }
 0x3bc   : > { %v475_v57 = vpop.f32.mrb[4].mxu1 }
 0x3bd   : > { %v529_v58 = vadd.f32 %v475_v57, %v420_v51  ;;  %v714_v59 = vpop.f32.mrb[5].mxu1 }
 0x3be   : > { %v478_v61 = vpop.f32.mrb[6].mxu1 }
 0x3bf   : > { %v533_v62 = vmul.f32 %v794_v60, %v529_v58  ;;  %v715_v63 = vpop.f32.mrb[7].mxu1 }
 0x3c0   : > { %v523_v0 = vpop.f32.mrb[8].mxu0 }
 0x3c1   : > { %535 = vst.msk [vmem:[%s213_s23] sm:$0xff] %vm306_vm2, %v533_v62  ;;  %v530_v1 = vadd.f32 %v523_v0, %v421_v55  ;;  %v720_v2 = vpop.f32.mrb[9].mxu0 }
 0x3c2   : > { %v526_v4 = vpop.f32.mrb[10].mxu0 }
 0x3c3   : > { %v534_v5 = vmul.f32 %v796_v3, %v530_v1  ;;  %v721_v6 = vpop.f32.mrb[11].mxu0 }
 0x3c5   : > { %536 = vst.msk [vmem:[%s213_s23 + $0x8] sm:$0xff] %vm306_vm2, %v534_v5 }
 0x3c6   : > { %810 = shalt.err (!%p807_p5)
}
 0x3c7   : > { %s811_s8 = scalar_lea.hbm %s998_s30, 256  ;;  %s815_s11 = scalar_lea.hbm %s1052_s3, 1024 }
 0x3c8   : > { %p812_p6 = scmp.ne.s32.totalorder %s998_s30, %s811_s8  ;;  %p816_p10 = scmp.lt.u32.totalorder %s998_s30, %s1052_s3 }
 0x3c9   : > { %p817_p11 = scmp.lt.u32.totalorder %s815_s11, %s811_s8  ;;  %p819_p13 = scmp.lt.u32.totalorder %s811_s8, %s998_s30 }
 0x3ca   : > { %p813_p7 = pnand %p812_p6, %p944_p4 }
 0x3cb   : > { %p818_p12 = por %p817_p11, %p816_p10 }
 0x3cc   : > { %p814_p9 = pneg %p813_p7 }
 0x3cd   : > { %p820_p0 = por %p819_p13, %p818_p12 }
 0x3cf   : > { %p821_p1 = pnand %p820_p0, %p814_p9 }
 0x3d1   : > { %824 = shalt.err (!%p821_p1)
}
 0x3d2   : > { %s882_s21 = smov 128   ;;  %s883_s23 = smov 8  }
 0x3d3   : > { %722 = dma.vmem_to_hbm [thread:$0]  (%p944_p4), %s1000_s26, 256, %s998_s30, %s1003_s15, %s882_s21, %s882_s21, %s883_s23  }
 0x3d4 PF: > { %p728_p2 = scmp.ge.s32.totalorder %s875_s17, 2  ;;  %s569_s27 = sand.u32 1, %s855_s12  }
 0x3d5   : > { %s570_s28 = scalar_lea.sflag [#allocation3], %s569_s27 }
 0x3d6   : > { %p725_p3 = pnand %p728_p2, %p951_p8 }
 0x3d8   : > { %850 = dma.done.wait (!%p725_p3), %s570_s28, 256  }
 0x3d9   : > { %852 = vsyncadd (!%p725_p3), %s570_s28, 4294967040  ;;  %s16_s17 = sadd.s32 1, %s875_s17   ;;  %s1055_s12 = smov %s859_s13 }
 0x3da   : > { %p13_p5 = scmp.ge.s32.totalorder %s16_s17, 6   ;;  %s1056_s13 = smov %s863_s14 }
 0x3db   : > { %s1057_s14 = smov %s957_s25  ;;  %s1058_s15 = smov %s871_s16 }
 0x3dc   : > { %s1059_s16 = smov %s1061_s20  ;;  %15 = sbr.rel (!%p13_p5) target bundleno = 4 (0x4), region = 73 }
 0x3e3   :  { %575 = vsyncpa [#allocation3], 1 }
 0x3e4   :  { %577 = vsyncpa [#allocation3 + $0x1], 1 }

</bundles_post_ra>
